<compile_context>
chip_gen: v7x
topology: tpu7x:2x2x1
jax: 0.10.0
libtpu: 0.0.40
codegen_flags: <defaults>
</compile_context>

<pallas_src>
import functools

import numpy as np
import jax
import jax.numpy as jnp
from jax.experimental import pallas as pl
from jax.experimental.pallas import tpu as pltpu


def conv_bn_relu6_kernel(x_ref, w_ref, b_ref, o_ref, *, k, stride, tile_h, wo):
    # x_ref: (1, H_pad, W_pad, C_in)   zero-padded NHWC image (resident per n)
    # w_ref: (k*k*C_in, C_out_pad)     BN-scale-folded weight matrix
    # b_ref: (1, C_out_pad)            folded BN bias (f32)
    # o_ref: (1, tile_h, Wo, C_out_pad) lane-dense output row-tile
    c_in = x_ref.shape[-1]
    c_out = w_ref.shape[-1]
    h_in = (tile_h - 1) * stride + k            # rows needed incl. halo

    h = pl.program_id(1)
    row0 = pl.multiple_of(h * (tile_h * stride), tile_h * stride)
    x_tile = x_ref[0, pl.ds(row0, h_in), :, :]  # (h_in, W_pad, C_in)

    # Fused im2col: concatenate the k*k shifted slices along the channel axis
    # (trace-time unrolled), then ONE MXU contraction over K = k*k*C_in.
    taps = []
    for i in range(k):
        for j in range(k):
            taps.append(jax.lax.slice(
                x_tile,
                (i, j, 0),
                (i + stride * (tile_h - 1) + 1,
                 j + stride * (wo - 1) + 1,
                 c_in),
                (stride, stride, 1)))           # (tile_h, wo, C_in)
    slab = jnp.concatenate(taps, axis=-1)       # (tile_h, wo, k*k*C_in)
    slab = slab.reshape(tile_h * wo, k * k * c_in)

    acc = jnp.dot(slab, w_ref[...], preferred_element_type=jnp.float32)
    y = jnp.clip(acc + b_ref[...], 0.0, 6.0)    # folded BN bias + ReLU6
    o_ref[...] = y.reshape(1, tile_h, wo, c_out).astype(o_ref.dtype)


def _pick_tile_h(ho, wo, max_rows=512):
    """Largest divisor of ho keeping tile_h*wo <= max_rows; prefer >=2 tiles."""
    cands = [t for t in range(1, ho + 1) if ho % t == 0 and t * wo <= max_rows]
    tile_h = max(cands) if cands else 1
    if tile_h == ho and ho % 2 == 0 and (ho // 2) * wo >= 64:
        tile_h = ho // 2                        # give the pipeline / 2nd TC work
    return tile_h


def basic_conv_forward(x, weight, gamma, beta, running_mean, running_var,
                       *, kernel_size, stride=1, eps=1e-5,
                       compute_dtype=jnp.bfloat16):
    """BasicConv forward. x: (N, C_in, H, W) f32. Returns (N, C_out, Ho, Wo) f32."""
    N, C_in, H, W = x.shape
    C_out = weight.shape[0]
    k = kernel_size
    pad = k // 2
    Ho = (H + 2 * pad - k) // stride + 1
    Wo = (W + 2 * pad - k) // stride + 1

    # TODO(synk): accept NHWC and fuse the zero-pad into the kernel (pl.ANY +
    # make_async_copy into zeroed VMEM) to kill these two extra HBM passes.
    x_nhwc = jnp.transpose(x, (0, 2, 3, 1))
    x_pad = jnp.pad(x_nhwc, ((0, 0), (pad, pad), (pad, pad), (0, 0)))
    H_pad, W_pad = H + 2 * pad, W + 2 * pad

    # Fold BN (inference) into the conv: scale -> weights, bias separate.
    scale = gamma / jnp.sqrt(running_var + eps)           # (C_out,)
    bias = beta - running_mean * scale                    # (C_out,)
    w_folded = weight * scale[:, None, None, None]        # (C_out, C_in, k, k)

    # (C_out, C_in, k, k) -> (k*k*C_in, C_out_pad) matching the slab's
    # (i, j, ci) channel order; pad C_out to 128 lanes for unmasked stores.
    C_out_pad = ((C_out + 127) // 128) * 128
    Kdim = k * k * C_in
    w_mat = jnp.transpose(w_folded, (2, 3, 1, 0)).reshape(Kdim, C_out)
    w_mat = jnp.pad(w_mat, ((0, 0), (0, C_out_pad - C_out)))
    bias_p = jnp.pad(bias, (0, C_out_pad - C_out)).reshape(1, C_out_pad)

    x_pad = x_pad.astype(compute_dtype)
    w_mat = w_mat.astype(compute_dtype)
    bias_p = bias_p.astype(jnp.float32)

    tile_h = _pick_tile_h(Ho, Wo)
    n_h = Ho // tile_h

    # VMEM budget: double-buffer the streamed blocks, constants counted once,
    # headroom for the slab + Mosaic internal scratch.  Cap at ~85% of the
    # queried per-generation VMEM capacity.
    isz = np.dtype(compute_dtype).itemsize
    x_blk = H_pad * W_pad * C_in * isz
    o_blk = tile_h * Wo * C_out_pad * 4
    const_bytes = Kdim * C_out_pad * isz + C_out_pad * 4
    needed = 2 * (x_blk + o_blk) + const_bytes + (8 << 20)
    try:
        cap = int(pltpu.get_tpu_info().vmem_capacity_bytes * 0.85)
    except Exception:
        cap = 48 << 20
    vmem_limit = int(min(max(needed, 16 << 20), cap))

    flops = 2 * N * Ho * Wo * C_out_pad * Kdim
    bytes_accessed = (N * H_pad * W_pad * C_in * isz
                      + Kdim * C_out_pad * isz
                      + C_out_pad * 4
                      + N * Ho * Wo * C_out_pad * 4)
    cost = pl.CostEstimate(flops=flops, transcendentals=0,
                           bytes_accessed=bytes_accessed)

    kernel = functools.partial(conv_bn_relu6_kernel,
                               k=k, stride=stride, tile_h=tile_h, wo=Wo)

    out = pl.pallas_call(
        kernel,
        out_shape=jax.ShapeDtypeStruct((N, Ho, Wo, C_out_pad), jnp.float32),
        grid_spec=pltpu.PrefetchScalarGridSpec(
            num_scalar_prefetch=0,
            grid=(N, n_h),
            in_specs=[
                # whole padded image; index_map constant in h => stays resident
                pl.BlockSpec((1, H_pad, W_pad, C_in), lambda n, h: (n, 0, 0, 0)),
                pl.BlockSpec((Kdim, C_out_pad), lambda n, h: (0, 0)),
                pl.BlockSpec((1, C_out_pad), lambda n, h: (0, 0)),
            ],
            out_specs=pl.BlockSpec((1, tile_h, Wo, C_out_pad),
                                   lambda n, h: (n, h, 0, 0)),
        ),
        compiler_params=pltpu.CompilerParams(
            dimension_semantics=("parallel", "parallel"),
            vmem_limit_bytes=vmem_limit,
        ),
        cost_estimate=cost,
    )(x_pad, w_mat, bias_p)

    # Strip channel padding; return NCHW to honor the PyTorch module contract.
    out = out[..., :C_out]
    return jnp.transpose(out, (0, 3, 1, 2))


def reference_forward(x, weight, gamma, beta, running_mean, running_var,
                      *, kernel_size, stride=1, eps=1e-5):
    pad = kernel_size // 2
    y = jax.lax.conv_general_dilated(
        x, weight, window_strides=(stride, stride),
        padding=[(pad, pad), (pad, pad)],
        dimension_numbers=("NCHW", "OIHW", "NCHW"))
    scale = gamma / jnp.sqrt(running_var + eps)
    bias = beta - running_mean * scale
    y = y * scale[None, :, None, None] + bias[None, :, None, None]
    return jnp.clip(y, 0.0, 6.0)


if __name__ == "__main__":
    key = jax.random.PRNGKey(0)
    k_x, k_w, k_g, k_b, k_m, k_v = jax.random.split(key, 6)

    N, C_in, H, W = 2, 4, 16, 16
    C_out, ksize, stride = 8, 3, 1
    pad = ksize // 2
    Ho = (H + 2 * pad - ksize) // stride + 1
    Wo = (W + 2 * pad - ksize) // stride + 1

    x = jax.random.normal(k_x, (N, C_in, H, W), dtype=jnp.float32)
    weight = jax.random.normal(k_w, (C_out, C_in, ksize, ksize),
                               dtype=jnp.float32) * 0.1
    gamma = jax.random.uniform(k_g, (C_out,), dtype=jnp.float32,
                               minval=0.5, maxval=1.5)
    beta = jax.random.normal(k_b, (C_out,), dtype=jnp.float32) * 0.1
    running_mean = jax.random.normal(k_m, (C_out,), dtype=jnp.float32) * 0.1
    running_var = jax.random.uniform(k_v, (C_out,), dtype=jnp.float32,
                                     minval=0.5, maxval=1.5)

    ref = reference_forward(x, weight, gamma, beta, running_mean, running_var,
                            kernel_size=ksize, stride=stride)
    ref = jax.block_until_ready(ref)

    # f32 compute path (tight tolerance).
    out_f32 = basic_conv_forward(x, weight, gamma, beta, running_mean,
                                 running_var, kernel_size=ksize, stride=stride,
                                 compute_dtype=jnp.float32)
    out_f32 = jax.block_until_ready(out_f32)
    assert out_f32.shape == (N, C_out, Ho, Wo), out_f32.shape
    assert jnp.allclose(out_f32, ref, atol=1e-4, rtol=1e-4), \
        f"f32 max abs err {jnp.max(jnp.abs(out_f32 - ref))}"

    # Default bf16-operand path (looser tolerance; f32 accumulation inside).
    out_bf16 = basic_conv_forward(x, weight, gamma, beta, running_mean,
                                  running_var, kernel_size=ksize, stride=stride)
    out_bf16 = jax.block_until_ready(out_bf16)
    assert out_bf16.shape == (N, C_out, Ho, Wo), out_bf16.shape
    assert jnp.allclose(out_bf16, ref, atol=3e-2, rtol=3e-2), \
        f"bf16 max abs err {jnp.max(jnp.abs(out_bf16 - ref))}"

    print("KERNEL_OK")
</pallas_src>

<mosaic_0001>
module attributes {stable_mosaic.version = 11 : i64} {
  func.func @conv_bn_relu6_kernel(%arg0: i32, %arg1: i32, %arg2: memref<1x18x18x4xf32, #tpu.memory_space<vmem>>, %arg3: memref<36x128xf32, #tpu.memory_space<vmem>>, %arg4: memref<1x128xf32, #tpu.memory_space<vmem>>, %arg5: memref<1x8x16x128xf32, #tpu.memory_space<vmem>>) attributes {dimension_semantics = [#tpu.dimension_semantics<parallel>, #tpu.dimension_semantics<parallel>], iteration_bounds = array<i64: 2, 2>, scalar_prefetch = 0 : i64, scratch_operands = 0 : i64, tpu.core_type = #tpu.core_type<tc>, window_params = [{transform_indices = @transform_0, window_bounds = array<i64: 1, 18, 18, 4>}, {pipeline_mode = #tpu.pipeline_mode<synchronous>, transform_indices = @transform_1, window_bounds = array<i64: 36, 128>}, {pipeline_mode = #tpu.pipeline_mode<synchronous>, transform_indices = @transform_2, window_bounds = array<i64: 1, 128>}, {transform_indices = @transform_3, window_bounds = array<i64: 1, 8, 16, 128>}]} {
    %c8_i32 = arith.constant 8 : i32
    %0 = arith.muli %arg1, %c8_i32 : i32
    %1 = tpu.assume_multiple %0, 8 : i32
    %c0 = arith.constant 0 : index
    %2 = arith.index_cast %1 : i32 to index
    %c0_0 = arith.constant 0 : index
    %c0_1 = arith.constant 0 : index
    %3 = vector.load %arg2[%c0, %2, %c0_0, %c0_1] : memref<1x18x18x4xf32, #tpu.memory_space<vmem>>, vector<1x10x18x4xf32>
    %4 = vector.shape_cast %3 : vector<1x10x18x4xf32> to vector<10x18x4xf32>
    %5 = vector.extract_strided_slice %4 {offsets = [0, 0, 0], sizes = [8, 16, 4], strides = [1, 1, 1]} : vector<10x18x4xf32> to vector<8x16x4xf32>
    %6 = vector.extract_strided_slice %4 {offsets = [0, 1, 0], sizes = [8, 16, 4], strides = [1, 1, 1]} : vector<10x18x4xf32> to vector<8x16x4xf32>
    %7 = vector.extract_strided_slice %4 {offsets = [0, 2, 0], sizes = [8, 16, 4], strides = [1, 1, 1]} : vector<10x18x4xf32> to vector<8x16x4xf32>
    %8 = vector.extract_strided_slice %4 {offsets = [1, 0, 0], sizes = [8, 16, 4], strides = [1, 1, 1]} : vector<10x18x4xf32> to vector<8x16x4xf32>
    %9 = vector.extract_strided_slice %4 {offsets = [1, 1, 0], sizes = [8, 16, 4], strides = [1, 1, 1]} : vector<10x18x4xf32> to vector<8x16x4xf32>
    %10 = vector.extract_strided_slice %4 {offsets = [1, 2, 0], sizes = [8, 16, 4], strides = [1, 1, 1]} : vector<10x18x4xf32> to vector<8x16x4xf32>
    %11 = vector.extract_strided_slice %4 {offsets = [2, 0, 0], sizes = [8, 16, 4], strides = [1, 1, 1]} : vector<10x18x4xf32> to vector<8x16x4xf32>
    %12 = vector.extract_strided_slice %4 {offsets = [2, 1, 0], sizes = [8, 16, 4], strides = [1, 1, 1]} : vector<10x18x4xf32> to vector<8x16x4xf32>
    %13 = vector.extract_strided_slice %4 {offsets = [2, 2, 0], sizes = [8, 16, 4], strides = [1, 1, 1]} : vector<10x18x4xf32> to vector<8x16x4xf32>
    %14 = tpu.concatenate %5, %6, %7, %8, %9, %10, %11, %12, %13 in 2 : vector<8x16x4xf32>, vector<8x16x4xf32>, vector<8x16x4xf32>, vector<8x16x4xf32>, vector<8x16x4xf32>, vector<8x16x4xf32>, vector<8x16x4xf32>, vector<8x16x4xf32>, vector<8x16x4xf32> -> vector<8x16x36xf32>
    %15 = vector.shape_cast %14 : vector<8x16x36xf32> to vector<128x36xf32>
    %c0_2 = arith.constant 0 : index
    %c0_3 = arith.constant 0 : index
    %16 = vector.load %arg3[%c0_2, %c0_3] : memref<36x128xf32, #tpu.memory_space<vmem>>, vector<36x128xf32>
    %cst = arith.constant dense<0.000000e+00> : vector<128x128xf32>
    %17 = tpu.matmul %15, %16, %cst {dimension_numbers = #tpu.dot_dimension_numbers<[1], [0], [0], [1], [0, 0, 1, 1], [], []>} : vector<128x36xf32>, vector<36x128xf32>, vector<128x128xf32> -> vector<128x128xf32>
    %c0_4 = arith.constant 0 : index
    %c0_5 = arith.constant 0 : index
    %18 = vector.load %arg4[%c0_4, %c0_5] : memref<1x128xf32, #tpu.memory_space<vmem>>, vector<1x128xf32>
    %19 = vector.broadcast %18 : vector<1x128xf32> to vector<128x128xf32>
    %20 = arith.addf %17, %19 : vector<128x128xf32>
    %cst_6 = arith.constant 0.000000e+00 : f32
    %cst_7 = arith.constant 6.000000e+00 : f32
    %21 = vector.broadcast %cst_6 : f32 to vector<128x128xf32>
    %22 = arith.maximumf %21, %20 : vector<128x128xf32>
    %23 = vector.broadcast %cst_7 : f32 to vector<128x128xf32>
    %24 = arith.minimumf %23, %22 : vector<128x128xf32>
    %25 = vector.shape_cast %24 : vector<128x128xf32> to vector<1x8x16x128xf32>
    %c0_8 = arith.constant 0 : index
    %c0_9 = arith.constant 0 : index
    %c0_10 = arith.constant 0 : index
    %c0_11 = arith.constant 0 : index
    %26 = vector.load %arg5[%c0_8, %c0_9, %c0_10, %c0_11] : memref<1x8x16x128xf32, #tpu.memory_space<vmem>>, vector<1x8x16x128xf32>
    tpu.vector_store %arg5[%c0_8, %c0_9, %c0_10, %c0_11], %25 {strides = array<i32>} : memref<1x8x16x128xf32, #tpu.memory_space<vmem>>, vector<1x8x16x128xf32>,
    return
  }
  func.func @transform_0(%arg0: i32, %arg1: i32) -> (i32, i32, i32, i32) {
    %c0_i32 = arith.constant 0 : i32
    %c0_i32_0 = arith.constant 0 : i32
    %c0_i32_1 = arith.constant 0 : i32
    %c0_i32_2 = arith.constant 0 : i32
    return %arg0, %c0_i32, %c0_i32_0, %c0_i32_1 : i32, i32, i32, i32
  }
  func.func @transform_1(%arg0: i32, %arg1: i32) -> (i32, i32) {
    %c0_i32 = arith.constant 0 : i32
    %c0_i32_0 = arith.constant 0 : i32
    %c0_i32_1 = arith.constant 0 : i32
    return %c0_i32, %c0_i32_0 : i32, i32
  }
  func.func @transform_2(%arg0: i32, %arg1: i32) -> (i32, i32) {
    %c0_i32 = arith.constant 0 : i32
    %c0_i32_0 = arith.constant 0 : i32
    %c0_i32_1 = arith.constant 0 : i32
    return %c0_i32, %c0_i32_0 : i32, i32
  }
  func.func @transform_3(%arg0: i32, %arg1: i32) -> (i32, i32, i32, i32) {
    %c0_i32 = arith.constant 0 : i32
    %c0_i32_0 = arith.constant 0 : i32
    %c0_i32_1 = arith.constant 0 : i32
    return %arg0, %arg1, %c0_i32, %c0_i32_0 : i32, i32, i32, i32
  }
}

</mosaic_0001>

<bundles_post_ra>
// kernel: tpu_custom_call.1
= control target key start
LH: loop header
LB: loop body
LE: loop exit
PB: predicated region body
PF: predicated region fallthrough
CT: control target
= control target key end

     0   :  { %8 = vsyncpa [#allocation3], 0  ;;  %s2360_s0 = inlined_call_operand.vmem [shape: f32[2,18,18,4], index: 0, kind: input, shape index: {}]   ;;  %s2361_s1 = inlined_call_operand.vmem [shape: f32[36,128], index: 1, kind: input, shape index: {}]   ;;  %s2362_s2 = inlined_call_operand.vmem [shape: f32[1,128], index: 2, kind: input, shape index: {}]   ;;  %s2363_s3 = inlined_call_operand.hbm [shape: f32[2,16,16,128], index: 3, kind: output, shape index: {}]  }
   0x1   :  { %10 = vsyncpa [#allocation3 + $0x1], 0  ;;  %s1533_s12 = smov 0   ;;  %s1535_s13 = smov 0  }
   0x2   :  { %s1537_s14 = smov 0   ;;  %s1539_s15 = smov 0  }
   0x3   :  { %s1541_s16 = smov 0   ;;  %s1543_s17 = smov 0  }
   0x4   :  { %s1545_s18 = smov 0   ;;  %s1547_s19 = smov 0  }
   0x5 LB: > { %s1222_s20 = sadd.s32 4294967295, %s1501_s19   ;;  %s1223_s21 = sadd.s32 4294967294, %s1501_s19   ;;  %s1501_s19 = sphi %s1547_s19, %s16_s19   ;;  %s1497_s18 = sphi %s1545_s18, %s2399_s18   ;;  %s1493_s17 = sphi %s1543_s17, %s2398_s17   ;;  %s1489_s16 = sphi %s1541_s16, %s2397_s16   ;;  %s1485_s15 = sphi %s1539_s15, %s2396_s15   ;;  %s1481_s14 = sphi %s1537_s14, %s2395_s14   ;;  %s1477_s13 = sphi %s1535_s13, %s2394_s13   ;;  %s1473_s12 = sphi %s1533_s12, %s2393_s12  }
   0x6   : > { %s25_s22 = sadd.s32 1, %s1493_s17  ;;  %s28_s23 = sadd.s32 1, %s1497_s18 }
   0x7   : > { %p26_p0 = scmp.ge.s32.totalorder %s25_s22, 2  ;;  %p115_p1 = scmp.ne.s32.totalorder %s1481_s14, %s1477_s13 }
   0x8   : > { %p116_p2 = scmp.eq.s32.totalorder %s1222_s20, 3  ;;  %p121_p5 = scmp.ne.s32.totalorder %s1477_s13, %s1473_s12 }
   0x9   : > { %s2401_s22 = smov (%p26_p0, %s25_s22), 0  ;;  %s2403_s23 = smov (!%p26_p0, %s28_s23), %s1497_s18 }
   0xa   : > { %s101_s24 = ssub.s32 %s1493_s17, %s2401_s22  ;;  %p1584_p3 = por %p116_p2, %p115_p1 }
   0xb   : > { %p30_p4 = scmp.ge.s32.totalorder %s2403_s23, 2  ;;  %p122_p6 = scmp.eq.s32.totalorder %s1223_s21, 3 }
   0xc   : > { %p1226_p7 = scmp.ge.s32.totalorder %s1501_s19, 1  ;;  %p154_p9 = scmp.lt.s32.totalorder %s1501_s19, 5 }
   0xd   : > { %s2405_s23 = smov (%p30_p4, %s2403_s23), 0  ;;  %p1593_p8 = por %p122_p6, %p121_p5 }
   0xe   : > { %s100_s27 = ssub.s32 %s1497_s18, %s2405_s23  ;;  %s105_s28 = sadd.s32 1, %s1481_s14 }
   0xf   : > { %s102_s29 = sor.u32 %s101_s24, %s100_s27  ;;  %p155_p10 = pnand %p1226_p7, %p154_p9 }
  0x10   : > { %p103_p11 = scmp.eq.s32.totalorder %s102_s29, 0 }
  0x11   : > { %158 = sbr.rel (%p155_p10) target bundleno = 639 (0x27f), region = 32 }
  0x12   : > { %s1602_s30 = scalar_select %p103_p11, %s1481_s14, %s105_s28  }
  0x18   : > { %p178_p12 = scmp.lt.s32.totalorder %s1489_s16, 1  ;;  %s1230_s5 = smul.u32 192, %s1485_s15  ;;  %vm241_vm0 = vcmask 1046528   ;;  %vm330_vm1 = vcmask 1045504   ;;  %vm930_vm2 = vcmask 1043456   ;;  %vm733_vm3 = vcmask 31744  }
  0x19   : > { %s1503_s11 = smov 4   ;;  %s1504_s20 = smov 8   ;;  %vm750_vm4 = vcmask 64512   ;;  %vm767_vm5 = vcmask 97280   ;;  %vm784_vm6 = vcmask 130048   ;;  %vm801_vm7 = vcmask 162816  }
  0x1a   : > { %s179_s4 = scalar_select %p178_p12, %s1489_s16, 1  ;;  %vm818_vm8 = vcmask 195584   ;;  %vm835_vm9 = vcmask 228352   ;;  %vm852_vm10 = vcmask 261120   ;;  %vm881_vm11 = vcmask 293888  }
  0x1b   : > { %s1505_s21 = smov 12   ;;  %s1506_s24 = smov 16  }
  0x1c   : > { %s1326_s6 = smul.u32 432, %s179_s4  ;;  %s1507_s27 = smov 20  }
  0x1d   : > { %s1508_s28 = smov 24   ;;  %s1509_s29 = smov 28  }
  0x1e   : > { %s182_s9 = scalar_lea.vmem %s2360_s0, %s1326_s6  ;;  %s1510_s6 = smov 32  }
  0x1f   : > { %s1610_s10 = scalar_lea.vmem %s182_s9, %s1230_s5 }
  0x20   : > { %v1613_v0 = vld [vmem:[%s1610_s10 + $0x8] sm:$0xff]  ;;  %v189_v1 = vld [vmem:[%s1610_s10 + $0x10] sm:$0x3]  ;;  %v1617_v2 = vld [vmem:[%s1610_s10] sm:$0xff] }
  0x21   : > { %v243_v3 = vrot.slane %v1613_v0, 1  ;;  %v245_v4 = vrot.slane %v189_v1, 1  ;;  %v242_v5 = vrot.slane %v1617_v2, 1  ;;  %v1622_v6 = vld [vmem:[%s1610_s10 + $0x68] sm:$0xff]  ;;  %v201_v7 = vld [vmem:[%s1610_s10 + $0x70] sm:$0x3] }
  0x22   : > { %v263_v8 = vrot.slane %v1622_v6, 1  ;;  %v265_v9 = vrot.slane %v201_v7, 1  ;;  %v1627_v10 = vld [vmem:[%s1610_s10 + $0x60] sm:$0xff]  ;;  %v352_v14 = vrot.slane %v1622_v6, 2  ;;  %v331_v15 = vrot.slane %v1617_v2, 2  ;;  %v1663_v26 = vld [vmem:[%s1610_s10 + $0x78] sm:$0xff] }
  0x23   : > { %v246_v11 = vsel %vm241_vm0, %v243_v3, %v245_v4  ;;  %v244_v12 = vsel %vm241_vm0, %v242_v5, %v243_v3  ;;  %v262_v13 = vrot.slane %v1627_v10, 1  ;;  %v351_v18 = vrot.slane %v1627_v10, 2  ;;  %v1666_v27 = vld [vmem:[%s1610_s10 + $0x18] sm:$0xff]  ;;  %v1669_v28 = vld [vmem:[%s1610_s10 + $0x80] sm:$0xff]  ;;  %v204_v36 = vld [vmem:[%s1610_s10 + $0x88] sm:$0x3] }
  0x24   : > { %284 = vrot.lane.b32.xlu1 %v246_v11, %s1503_s11  ;;  %282 = vrot.lane.b32.xlu0 %v244_v12, %s1503_s11  ;;  %v1637_v16 = vsel %vm241_vm0, %v263_v8, %v265_v9  ;;  %v332_v19 = vrot.slane %v1613_v0, 2  ;;  %v354_v22 = vrot.slane %v201_v7, 2  ;;  %v334_v23 = vrot.slane %v189_v1, 2  ;;  %v1672_v29 = vld [vmem:[%s1610_s10 + $0x20] sm:$0xff]  ;;  %v192_v37 = vld [vmem:[%s1610_s10 + $0x28] sm:$0x3] }
  0x25   : > { %v1640_v17 = vsel %vm241_vm0, %v262_v13, %v263_v8  ;;  %v1649_v20 = vsel %vm330_vm1, %v351_v18, %v352_v14  ;;  %v267_v30 = vrot.slane %v1663_v26, 1  ;;  %v268_v31 = vrot.slane %v1669_v28, 1  ;;  %v1730_v52 = vld [vmem:[%s1610_s10 + $0x90] sm:$0xff]  ;;  %v1743_v54 = vld [vmem:[%s1610_s10 + $0x98] sm:$0xff]  ;;  %v207_v62 = vld [vmem:[%s1610_s10 + $0xa0] sm:$0x3] }
  0x26   : > { %v333_v21 = vsel %vm330_vm1, %v331_v15, %v332_v19  ;;  %v1656_v24 = vsel %vm330_vm1, %v352_v14, %v354_v22  ;;  %v335_v25 = vsel %vm330_vm1, %v332_v19, %v334_v23  ;;  %v247_v32 = vrot.slane %v1666_v27, 1  ;;  %v1733_v53 = vld [vmem:[%s1610_s10 + $0x30] sm:$0xff]  ;;  %v1746_v55 = vld [vmem:[%s1610_s10 + $0x38] sm:$0xff]  ;;  %v195_v63 = vld [vmem:[%s1610_s10 + $0x40] sm:$0x3] }
  0x27   : > { %v248_v33 = vrot.slane %v1672_v29, 1  ;;  %v1687_v34 = vsel %vm241_vm0, %v267_v30, %v268_v31  ;;  %v270_v38 = vrot.slane %v204_v36, 1  ;;  %v250_v39 = vrot.slane %v192_v37, 1  ;;  %2379 = vst [vmem:[#allocation9_spill] sm:$0xff] %v1746_v55  ;;  %v869_v8 = vld [vmem:[%s2361_s1] sm:$0xff]  ;;  %v870_v9 = vld [vmem:[%s2361_s1 + $0x8] sm:$0xff] }
  0x28   : > { %300 = vrot.lane.b32.xlu1 %v1637_v16, %s1503_s11  ;;  %298 = vrot.lane.b32.xlu0 %v1640_v17, %s1503_s11  ;;  %2375 = vst [vmem:[#allocation5_spill] sm:$0xff] %v1687_v34  ;;  %v356_v40 = vrot.slane %v1663_v26, 2  ;;  %v357_v41 = vrot.slane %v1669_v28, 2  ;;  %v336_v44 = vrot.slane %v1666_v27, 2  ;;  %v337_v45 = vrot.slane %v1672_v29, 2  ;;  %v871_v15 = vld [vmem:[%s2361_s1 + $0x10] sm:$0xff] }
  0x29   : > { %v249_v35 = vsel %vm241_vm0, %v247_v32, %v248_v33  ;;  %v1701_v42 = vsel %vm241_vm0, %v268_v31, %v270_v38  ;;  %v251_v43 = vsel %vm241_vm0, %v248_v33, %v250_v39  ;;  %v359_v48 = vrot.slane %v204_v36, 2  ;;  %v872_v18 = vld [vmem:[%s2361_s1 + $0x18] sm:$0xff]  ;;  %v873_v23 = vld [vmem:[%s2361_s1 + $0x20] sm:$0xf]  ;;  %v1816_v33 = vld [vmem:[%s1610_s10 + $0xa8] sm:$0xff] }
  0x2a   : > { %2376 = vst [vmem:[#allocation6_spill] sm:$0xff] %v1701_v42  ;;  %v1710_v46 = vsel %vm330_vm1, %v356_v40, %v357_v41  ;;  %v338_v47 = vsel %vm330_vm1, %v336_v44, %v337_v45  ;;  %v339_v49 = vrot.slane %v192_v37, 2  ;;  %v272_v56 = vrot.slane %v1730_v52, 1  ;;  %2380 = vst [vmem:[#allocation10_spill] sm:$0xff] %v1816_v33  ;;  %v1843_v44 = vld [vmem:[%s1610_s10 + $0x50] sm:$0xff] }
  0x2b   : > { %2377 = vst [vmem:[#allocation7_spill] sm:$0xff] %v1710_v46  ;;  %v1723_v50 = vsel %vm330_vm1, %v357_v41, %v359_v48  ;;  %v273_v57 = vrot.slane %v1743_v54, 1  ;;  %v252_v58 = vrot.slane %v1733_v53, 1  ;;  %v253_v59 = vrot.slane %v1746_v55, 1  ;;  %2383 = vst [vmem:[#allocation13_spill] sm:$0xff] %v1843_v44 }
  0x2c   : > { %387 = vrot.lane.b32.xlu1 %v1649_v20, %s1504_s20  ;;  %371 = vrot.lane.b32.xlu0 %v333_v21, %s1504_s20  ;;  %2378 = vst [vmem:[#allocation8_spill] sm:$0xff] %v1723_v50  ;;  %v340_v51 = vsel %vm330_vm1, %v337_v45, %v339_v49  ;;  %v275_v1 = vrot.slane %v207_v62, 1  ;;  %v255_v3 = vrot.slane %v195_v63, 1  ;;  %v361_v4 = vrot.slane %v1730_v52, 2 }
  0x2d   : > { %v274_v60 = vsel %vm241_vm0, %v272_v56, %v273_v57  ;;  %v254_v61 = vsel %vm241_vm0, %v252_v58, %v253_v59  ;;  %v362_v5 = vrot.slane %v1743_v54, 2  ;;  %v341_v7 = vrot.slane %v1733_v53, 2 }
  0x2e   : > { %v276_v11 = vsel %vm241_vm0, %v273_v57, %v275_v1  ;;  %v256_v12 = vsel %vm241_vm0, %v253_v59, %v255_v3  ;;  %v342_v13 = vrot.slane %v1746_v55, 2  ;;  %v1312_v14 = vpack.c.bf16 %v870_v9, %v869_v8 }
  0x2f   : > { %v363_v19 = vsel %vm330_vm1, %v361_v4, %v362_v5  ;;  %v1316_v22 = vpack.c.bf16 %v872_v18, %v871_v15  ;;  %v344_v30 = vrot.slane %v195_v63, 2  ;;  %v277_v45 = vrot.slane %v1816_v33, 1 }
  0x30   : > { %389 = vrot.lane.b32.xlu1 %v1656_v24, %s1504_s20  ;;  %373 = vrot.lane.b32.xlu0 %v335_v25, %s1504_s20  ;;  %v343_v21 = vsel %vm330_vm1, %v341_v7, %v342_v13  ;;  %v364_v25 = vrot.slane %v207_v62, 2  ;;  %v258_v49 = vrot.slane %v1843_v44, 1  ;;  %v198_v62 = vld [vmem:[%s1610_s10 + $0x58] sm:$0x3] }
  0x31   : > { %1313 = vmatprep.subr.bf16.mxu0 %v1312_v14  ;;  %1320 = vmatprep.subr.bf16.mxu1 %v1312_v14  ;;  %v345_v32 = vsel %vm330_vm1, %v342_v13, %v344_v30  ;;  %v260_v4 = vrot.slane %v198_v62, 1 }
  0x32   : > { %1315 = vmatpush3.bf16.msra.mxu0 %v1312_v14  ;;  %1323 = vmatpush3.bf16.msra.mxu1 %v1312_v14  ;;  %v365_v31 = vsel %vm330_vm1, %v362_v5, %v364_v25  ;;  %v347_v14 = vrot.slane %v1843_v44, 2 }
  0x33   : > { %1317 = vmatprep.subr.bf16.mxu0 %v1316_v22  ;;  %1321 = vmatprep.subr.bf16.mxu1 %v1316_v22  ;;  %v261_v9 = vsel %vm241_vm0, %v258_v49, %v260_v4 }
  0x34   : > { %437 = vrot.lane.b32.xlu1 %v1663_v26, %s1505_s21  ;;  %421 = vrot.lane.b32.xlu0 %v1666_v27, %s1505_s21 }
  0x36   : > { %1319 = vmatpush3.bf16.msra.mxu0 %v1316_v22  ;;  %1324 = vmatpush3.bf16.msra.mxu1 %v1316_v22 }
  0x37   : > { %1286 = vmatprep.subr.msk.mxu0 %vm930_vm2, %v873_v23  ;;  %1322 = vmatprep.subr.msk.mxu1 %vm930_vm2, %v873_v23 }
  0x38   : > { %439 = vrot.lane.b32.xlu1 %v1669_v28, %s1505_s21  ;;  %423 = vrot.lane.b32.xlu0 %v1672_v29, %s1505_s21 }
  0x3a   : > { %1287 = vmatpush3.msk.msra.mxu0 %vm930_vm2, %v873_v23  ;;  %1325 = vmatpush3.msk.msra.mxu1 %vm930_vm2, %v873_v23 }
  0x3c   : > { %491 = vrot.lane.b32.xlu1 %v1687_v34, %s1506_s24  ;;  %475 = vrot.lane.b32.xlu0 %v249_v35, %s1506_s24 }
  0x40   : > { %302 = vrot.lane.b32.xlu1 %v1687_v34, %s1503_s11  ;;  %286 = vrot.lane.b32.xlu0 %v249_v35, %s1503_s11  ;;  %v1819_v35 = vld [vmem:[%s1610_s10 + $0x48] sm:$0xff] }
  0x41   : > { %2381 = vst [vmem:[#allocation11_spill] sm:$0xff] %v1819_v35  ;;  %v257_v48 = vrot.slane %v1819_v35, 1  ;;  %v346_v13 = vrot.slane %v1819_v35, 2 }
  0x43   : > { %v259_v58 = vsel %vm241_vm0, %v257_v48, %v258_v49 }
  0x44   : > { %493 = vrot.lane.b32.xlu1 %v1701_v42, %s1506_s24  ;;  %477 = vrot.lane.b32.xlu0 %v251_v43, %s1506_s24 }
  0x48   : > { %544 = vrot.lane.b32.xlu1 %v1710_v46, %s1507_s27  ;;  %528 = vrot.lane.b32.xlu0 %v338_v47, %s1507_s27 }
  0x4c   : > { %304 = vrot.lane.b32.xlu1 %v1701_v42, %s1503_s11  ;;  %288 = vrot.lane.b32.xlu0 %v251_v43, %s1503_s11  ;;  %v1840_v43 = vld [vmem:[%s1610_s10 + $0xb0] sm:$0xff] }
  0x4d   : > { %2382 = vst [vmem:[#allocation12_spill] sm:$0xff] %v1840_v43 }
  0x50   : > { %391 = vrot.lane.b32.xlu1 %v1710_v46, %s1504_s20  ;;  %375 = vrot.lane.b32.xlu0 %v338_v47, %s1504_s20  ;;  %v278_v47 = vrot.slane %v1840_v43, 1 }
  0x52   : > { %v279_v57 = vsel %vm241_vm0, %v277_v45, %v278_v47 }
  0x54   : > { %546 = vrot.lane.b32.xlu1 %v1723_v50, %s1507_s27  ;;  %530 = vrot.lane.b32.xlu0 %v340_v51, %s1507_s27 }
  0x58   : > { %594 = vrot.lane.b32.xlu1 %v1730_v52, %s1508_s28  ;;  %578 = vrot.lane.b32.xlu0 %v1733_v53, %s1508_s28 }
  0x5c   : > { %393 = vrot.lane.b32.xlu1 %v1723_v50, %s1504_s20  ;;  %377 = vrot.lane.b32.xlu0 %v340_v51, %s1504_s20 }
  0x60   : > { %441 = vrot.lane.b32.xlu1 %v1730_v52, %s1505_s21  ;;  %425 = vrot.lane.b32.xlu0 %v1733_v53, %s1505_s21 }
  0x64   : > { %596 = vrot.lane.b32.xlu1 %v1743_v54, %s1508_s28  ;;  %580 = vrot.lane.b32.xlu0 %v1746_v55, %s1508_s28 }
  0x68   : > { %648 = vrot.lane.b32.xlu1 %v274_v60, %s1509_s29  ;;  %632 = vrot.lane.b32.xlu0 %v254_v61, %s1509_s29 }
  0x6c   : > { %443 = vrot.lane.b32.xlu1 %v1743_v54, %s1505_s21  ;;  %427 = vrot.lane.b32.xlu0 %v1746_v55, %s1505_s21 }
  0x70   : > { %495 = vrot.lane.b32.xlu1 %v274_v60, %s1506_s24  ;;  %479 = vrot.lane.b32.xlu0 %v254_v61, %s1506_s24 }
  0x74   : > { %650 = vrot.lane.b32.xlu1 %v276_v11, %s1509_s29  ;;  %634 = vrot.lane.b32.xlu0 %v256_v12, %s1509_s29 }
  0x78   : > { %701 = vrot.lane.b32.xlu1 %v363_v19, %s1510_s6  ;;  %685 = vrot.lane.b32.xlu0 %v343_v21, %s1510_s6 }
  0x7c   : > { %306 = vrot.lane.b32.xlu1 %v274_v60, %s1503_s11  ;;  %290 = vrot.lane.b32.xlu0 %v254_v61, %s1503_s11  ;;  %v210_v61 = vld [vmem:[%s1610_s10 + $0xb8] sm:$0x3] }
  0x7d   : > { %v280_v3 = vrot.slane %v210_v61, 1  ;;  %v369_v45 = vrot.slane %v210_v61, 2 }
  0x7f   : > { %v281_v8 = vsel %vm241_vm0, %v278_v47, %v280_v3  ;;  %v349_v47 = vrot.slane %v198_v62, 2 }
  0x80   : > { %497 = vrot.lane.b32.xlu1 %v276_v11, %s1506_s24  ;;  %481 = vrot.lane.b32.xlu0 %v256_v12, %s1506_s24 }
  0x84   : > { %548 = vrot.lane.b32.xlu1 %v363_v19, %s1507_s27  ;;  %532 = vrot.lane.b32.xlu0 %v343_v21, %s1507_s27 }
  0x88   : > { %703 = vrot.lane.b32.xlu1 %v365_v31, %s1510_s6  ;;  %687 = vrot.lane.b32.xlu0 %v345_v32, %s1510_s6 }
  0x8c   : > { %308 = vrot.lane.b32.xlu1 %v276_v11, %s1503_s11  ;;  %292 = vrot.lane.b32.xlu0 %v256_v12, %s1503_s11  ;;  %v366_v11 = vrot.slane %v1816_v33, 2  ;;  %v367_v12 = vrot.slane %v1840_v43, 2 }
  0x90   : > { %395 = vrot.lane.b32.xlu1 %v363_v19, %s1504_s20  ;;  %379 = vrot.lane.b32.xlu0 %v343_v21, %s1504_s20  ;;  %v368_v19 = vsel %vm330_vm1, %v366_v11, %v367_v12  ;;  %v348_v21 = vsel %vm330_vm1, %v346_v13, %v347_v14 }
  0x94   : > { %550 = vrot.lane.b32.xlu1 %v365_v31, %s1507_s27  ;;  %534 = vrot.lane.b32.xlu0 %v345_v32, %s1507_s27 }
  0x96   : > { %v1821_v36 = vpop.permute.xlu1 %284  ;;  %v1823_v37 = vpop.permute.xlu0 %282 }
  0x98   : > { %598 = vrot.lane.b32.xlu1 %v1816_v33, %s1508_s28  ;;  %582 = vrot.lane.b32.xlu0 %v1819_v35, %s1508_s28 }
  0x9a   : > { %v1829_v38 = vpop.permute.xlu1 %300  ;;  %v1831_v39 = vpop.permute.xlu0 %298 }
  0x9c   : > { %397 = vrot.lane.b32.xlu1 %v365_v31, %s1504_s20  ;;  %381 = vrot.lane.b32.xlu0 %v345_v32, %s1504_s20 }
  0x9e   : > { %v1835_v40 = vpop.permute.xlu1 %387  ;;  %v1837_v41 = vpop.permute.xlu0 %371 }
  0xa0   : > { %445 = vrot.lane.b32.xlu1 %v1816_v33, %s1505_s21  ;;  %429 = vrot.lane.b32.xlu0 %v1819_v35, %s1505_s21 }
  0xa2   : > { %v1853_v51 = vpop.permute.xlu1 %389  ;;  %v1855_v56 = vpop.permute.xlu0 %373 }
  0xa4   : > { %600 = vrot.lane.b32.xlu1 %v1840_v43, %s1508_s28  ;;  %584 = vrot.lane.b32.xlu0 %v1843_v44, %s1508_s28 }
  0xa6   : > { %v1863_v59 = vpop.permute.xlu1 %437  ;;  %v1865_v60 = vpop.permute.xlu0 %421 }
  0xa8   : > { %652 = vrot.lane.b32.xlu1 %v279_v57, %s1509_s29  ;;  %636 = vrot.lane.b32.xlu0 %v259_v58, %s1509_s29 }
  0xaa   : > { %v1871_v63 = vpop.permute.xlu1 %439  ;;  %v1873_v1 = vpop.permute.xlu0 %423 }
  0xac   : > { %447 = vrot.lane.b32.xlu1 %v1840_v43, %s1505_s21  ;;  %431 = vrot.lane.b32.xlu0 %v1843_v44, %s1505_s21  ;;  %v1955_v43 = vld [vmem:[%s1610_s10 + $0xc8] sm:$0xff] }
  0xad   : > { %v471_v46 = vrot.slane %v1955_v43, 1 }
  0xae   : > { %v1879_v5 = vpop.permute.xlu1 %491  ;;  %v1881_v7 = vpop.permute.xlu0 %475 }
  0xb0   : > { %499 = vrot.lane.b32.xlu1 %v279_v57, %s1506_s24  ;;  %483 = vrot.lane.b32.xlu0 %v259_v58, %s1506_s24 }
  0xb2   : > { %v303_v15 = vpop.permute.xlu1 %302  ;;  %v287_v18 = vpop.permute.xlu0 %286 }
  0xb3   : > { %v744_v35 = vsel %vm733_vm3, %v1663_v26, %v303_v15  ;;  %v736_v33 = vsel %vm733_vm3, %v1666_v27, %v287_v18 }
  0xb4   : > { %654 = vrot.lane.b32.xlu1 %v281_v8, %s1509_s29  ;;  %638 = vrot.lane.b32.xlu0 %v261_v9, %s1509_s29 }
  0xb6   : > { %v1895_v22 = vpop.permute.xlu1 %493  ;;  %v1897_v23 = vpop.permute.xlu0 %477 }
  0xb8   : > { %705 = vrot.lane.b32.xlu1 %v368_v19, %s1510_s6  ;;  %689 = vrot.lane.b32.xlu0 %v348_v21, %s1510_s6 }
  0xba   : > { %v1901_v25 = vpop.permute.xlu1 %544  ;;  %v1903_v30 = vpop.permute.xlu0 %528 }
  0xbc   : > { %310 = vrot.lane.b32.xlu1 %v279_v57, %s1503_s11  ;;  %294 = vrot.lane.b32.xlu0 %v259_v58, %s1503_s11  ;;  %v370_v57 = vsel %vm330_vm1, %v367_v12, %v369_v45  ;;  %v350_v58 = vsel %vm330_vm1, %v347_v14, %v349_v47  ;;  %v1938_v45 = vld [vmem:[%s1610_s10 + $0xc0] sm:$0xff] }
  0xbd   : > { %v470_v50 = vrot.slane %v1938_v45, 1 }
  0xbe   : > { %v1907_v31 = vpop.permute.xlu1 %304  ;;  %v1909_v32 = vpop.permute.xlu0 %288 }
  0xc0   : > { %501 = vrot.lane.b32.xlu1 %v281_v8, %s1506_s24  ;;  %485 = vrot.lane.b32.xlu0 %v261_v9, %s1506_s24 }
  0xc2   : > { %v392_v48 = vpop.permute.xlu1 %391  ;;  %v376_v49 = vpop.permute.xlu0 %375 }
  0xc4   : > { %552 = vrot.lane.b32.xlu1 %v368_v19, %s1507_s27  ;;  %536 = vrot.lane.b32.xlu0 %v348_v21, %s1507_s27 }
  0xc6   : > { %v1917_v3 = vpop.permute.xlu1 %546  ;;  %v1919_v4 = vpop.permute.xlu0 %530 }
  0xc8   : > { %707 = vrot.lane.b32.xlu1 %v370_v57, %s1510_s6  ;;  %691 = vrot.lane.b32.xlu0 %v350_v58, %s1510_s6 }
  0xca   : > { %v1923_v61 = vpop.permute.xlu1 %594  ;;  %v1925_v62 = vpop.permute.xlu0 %578 }
  0xcc   : > { %312 = vrot.lane.b32.xlu1 %v281_v8, %s1503_s11  ;;  %296 = vrot.lane.b32.xlu0 %v261_v9, %s1503_s11  ;;  %s1511_s11 = smov [#allocation2]  }
  0xce   : > { %v1929_v11 = vpop.permute.xlu1 %393  ;;  %v1931_v12 = vpop.permute.xlu0 %377 }
  0xd0   : > { %399 = vrot.lane.b32.xlu1 %v368_v19, %s1504_s20  ;;  %383 = vrot.lane.b32.xlu0 %v348_v21, %s1504_s20 }
  0xd2   : > { %v442_v13 = vpop.permute.xlu1 %441  ;;  %v426_v14 = vpop.permute.xlu0 %425 }
  0xd4   : > { %554 = vrot.lane.b32.xlu1 %v370_v57, %s1507_s27  ;;  %538 = vrot.lane.b32.xlu0 %v350_v58, %s1507_s27 }
  0xd6   : > { %v1940_v8 = vpop.permute.xlu1 %596  ;;  %v1942_v9 = vpop.permute.xlu0 %580 }
  0xd8   : > { %602 = vrot.lane.b32.xlu1 %v1938_v45, %s1508_s28  ;;  %586 = vrot.lane.b32.xlu0 %v1627_v10, %s1508_s28 }
  0xda   : > { %v649_v19 = vpop.permute.xlu1 %648  ;;  %v633_v21 = vpop.permute.xlu0 %632 }
  0xdc   : > { %401 = vrot.lane.b32.xlu1 %v370_v57, %s1504_s20  ;;  %385 = vrot.lane.b32.xlu0 %v350_v58, %s1504_s20  ;;  %v761_v57 = vsel %vm750_vm4, %v744_v35, %v392_v48  ;;  %v753_v58 = vsel %vm750_vm4, %v736_v33, %v376_v49  ;;  %v734_v33 = vsel %vm733_vm3, %v1617_v2, %v1823_v37 }
  0xdd   : > { %v778_v15 = vsel %vm767_vm5, %v761_v57, %v442_v13  ;;  %v770_v42 = vsel %vm767_vm5, %v753_v58, %v426_v14  ;;  %v742_v35 = vsel %vm733_vm3, %v1627_v10, %v1831_v39  ;;  %v472_v49 = vsel %vm241_vm0, %v470_v50, %v471_v46 }
  0xde   : > { %v1950_v47 = vpop.permute.xlu1 %443  ;;  %v1952_v44 = vpop.permute.xlu0 %427  ;;  %v759_v48 = vsel %vm750_vm4, %v742_v35, %v1835_v40  ;;  %v524_v35 = vrot.slane %v1955_v43, 2 }
  0xdf   : > { %v776_v2 = vsel %vm767_vm5, %v759_v48, %v1863_v59 }
  0xe0   : > { %449 = vrot.lane.b32.xlu1 %v1938_v45, %s1505_s21  ;;  %433 = vrot.lane.b32.xlu0 %v1627_v10, %s1505_s21  ;;  %v793_v13 = vsel %vm784_vm6, %v776_v2, %v1879_v5 }
  0xe1   : > { %v810_v50 = vsel %vm801_vm7, %v793_v13, %v1901_v25 }
  0xe2   : > { %v496_v27 = vpop.permute.xlu1 %495  ;;  %v480_v18 = vpop.permute.xlu0 %479  ;;  %v827_v59 = vsel %vm818_vm8, %v810_v50, %v1923_v61 }
  0xe3   : > { %v1972_v34 = vsel %vm784_vm6, %v778_v15, %v496_v27  ;;  %v1975_v55 = vsel %vm784_vm6, %v770_v42, %v480_v18  ;;  %v751_v42 = vsel %vm750_vm4, %v734_v33, %v1837_v41  ;;  %v844_v5 = vsel %vm835_vm9, %v827_v59, %v649_v19 }
  0xe4   : > { %604 = vrot.lane.b32.xlu1 %v1955_v43, %s1508_s28  ;;  %588 = vrot.lane.b32.xlu0 %v1622_v6, %s1508_s28  ;;  %v768_v10 = vsel %vm767_vm5, %v751_v42, %v1865_v60  ;;  %v737_v15 = vsel %vm733_vm3, %v1672_v29, %v1909_v32  ;;  %v523_v27 = vrot.slane %v1938_v45, 2 }
  0xe5   : > { %v785_v40 = vsel %vm784_vm6, %v768_v10, %v1881_v7  ;;  %v754_v33 = vsel %vm750_vm4, %v737_v15, %v1931_v12 }
  0xe6   : > { %v651_v37 = vpop.permute.xlu1 %650  ;;  %v635_v39 = vpop.permute.xlu0 %634  ;;  %v802_v41 = vsel %vm801_vm7, %v785_v40, %v1903_v30  ;;  %v213_v30 = vld [vmem:[%s1610_s10 + $0xd0] sm:$0x3]  ;;  %v771_v32 = vsel %vm767_vm5, %v754_v33, %v1952_v44 }
  0xe7   : > { %v819_v60 = vsel %vm818_vm8, %v802_v41, %v1925_v62  ;;  %v473_v61 = vrot.slane %v213_v30, 1 }
  0xe8   : > { %656 = vrot.lane.b32.xlu1 %v472_v49, %s1509_s29  ;;  %640 = vrot.lane.b32.xlu0 %v1640_v17, %s1509_s29  ;;  %v836_v7 = vsel %vm835_vm9, %v819_v60, %v633_v21  ;;  %v745_v21 = vsel %vm733_vm3, %v1669_v28, %v1907_v31 }
  0xe9   : > { %v762_v18 = vsel %vm750_vm4, %v745_v21, %v1929_v11  ;;  %v474_v31 = vsel %vm241_vm0, %v471_v46, %v473_v61  ;;  %v743_v46 = vsel %vm733_vm3, %v1622_v6, %v1829_v38 }
  0xea   : > { %v702_v25 = vpop.permute.xlu1 %701  ;;  %v686_v14 = vpop.permute.xlu0 %685  ;;  %v779_v29 = vsel %vm767_vm5, %v762_v18, %v1950_v47  ;;  %v525_v47 = vsel %vm330_vm1, %v523_v27, %v524_v35 }
  0xeb   : > { %v861_v57 = vsel %vm852_vm10, %v844_v5, %v702_v25  ;;  %v853_v58 = vsel %vm852_vm10, %v836_v7, %v686_v14  ;;  %v215_v7 = vld [vmem:[%s1610_s10 + $0xe0] sm:$0xff] }
  0xec   : > { %451 = vrot.lane.b32.xlu1 %v1955_v43, %s1505_s21  ;;  %1300 = vmatprep.mubr.msk.f32.mxu1 %vm881_vm11, %v861_v57  ;;  %v760_v43 = vsel %vm750_vm4, %v743_v46, %v1853_v51  ;;  %v628_v14 = vrot.slane %v215_v7, 1  ;;  %v2384_v57 = vld [vmem:[#allocation9_spill] sm:$0xff] }
  0xed   : > { %435 = vrot.lane.b32.xlu0 %v1622_v6, %s1505_s21  ;;  %1288 = vmatprep.mubr.msk.f32.mxu0 %vm881_vm11, %v853_v58  ;;  %s1411_s21 = sshll.u32 %s1511_s11, 4  ;;  %s1412_s21 = int_to_ptr.vmem [resolvable:$false] %s1411_s21 }
  0xee   : > { %v307_v62 = vpop.permute.xlu1 %306  ;;  %v291_v19 = vpop.permute.xlu0 %290 }
  0xef   : > { %v746_v13 = vsel %vm733_vm3, %v1730_v52, %v307_v62  ;;  %v214_v52 = vld [vmem:[%s1610_s10 + $0xd8] sm:$0xff] }
  0xf0   : > { %503 = vrot.lane.b32.xlu1 %v472_v49, %s1506_s24  ;;  %v627_v25 = vrot.slane %v214_v52, 1 }
  0xf1   : > { %487 = vrot.lane.b32.xlu0 %v1640_v17, %s1506_s24  ;;  %v735_v17 = vsel %vm733_vm3, %v1613_v0, %v1821_v36  ;;  %v777_v0 = vsel %vm767_vm5, %v760_v43, %v1871_v63 }
  0xf2   : > { %v498_v45 = vpop.permute.xlu1 %497  ;;  %v482_v48 = vpop.permute.xlu0 %481  ;;  %v752_v44 = vsel %vm750_vm4, %v735_v17, %v1855_v56  ;;  %v794_v51 = vsel %vm784_vm6, %v777_v0, %v1895_v22 }
  0xf3   : > { %v2043_v11 = vsel %vm784_vm6, %v779_v29, %v498_v45  ;;  %v2046_v12 = vsel %vm784_vm6, %v771_v32, %v482_v48  ;;  %v769_v36 = vsel %vm767_vm5, %v752_v44, %v1873_v1  ;;  %v811_v42 = vsel %vm801_vm7, %v794_v51, %v1917_v3  ;;  %v2385_v29 = vld [vmem:[#allocation5_spill] sm:$0xff]  ;;  %v2386_v48 = vld [vmem:[#allocation6_spill] sm:$0xff] }
  0xf4   : > { %658 = vrot.lane.b32.xlu1 %v474_v31, %s1509_s29  ;;  %v786_v56 = vsel %vm784_vm6, %v769_v36, %v1897_v23  ;;  %v828_v63 = vsel %vm818_vm8, %v811_v42, %v1940_v8  ;;  %v526_v8 = vrot.slane %v213_v30, 2 }
  0xf5   : > { %642 = vrot.lane.b32.xlu0 %v1637_v16, %s1509_s29  ;;  %v803_v49 = vsel %vm801_vm7, %v786_v56, %v1919_v4  ;;  %v845_v22 = vsel %vm835_vm9, %v828_v63, %v651_v37 }
  0xf6   : > { %v2066_v6 = vpop.permute.xlu1 %548  ;;  %v2068_v38 = vpop.permute.xlu0 %532  ;;  %v820_v1 = vsel %vm818_vm8, %v803_v49, %v1942_v9  ;;  %v2388_v49 = vld [vmem:[#allocation8_spill] sm:$0xff] }
  0xf7   : > { %v837_v23 = vsel %vm835_vm9, %v820_v1, %v635_v39  ;;  %v527_v39 = vsel %vm330_vm1, %v524_v35, %v526_v8  ;;  %v680_v35 = vrot.slane %v214_v52, 2 }
  0xf8   : > { %709 = vrot.lane.b32.xlu1 %v525_v47, %s1510_s6 }
  0xf9   : > { %693 = vrot.lane.b32.xlu0 %v1649_v20, %s1510_s6 }
  0xfa   : > { %v704_v2 = vpop.permute.xlu1 %703  ;;  %v688_v3 = vpop.permute.xlu0 %687 }
  0xfb   : > { %v862_v10 = vsel %vm852_vm10, %v845_v22, %v704_v2  ;;  %v854_v4 = vsel %vm852_vm10, %v837_v23, %v688_v3 }
  0xfc   : > { %505 = vrot.lane.b32.xlu1 %v474_v31, %s1506_s24  ;;  %1301 = vmatmul.mubr.msk.f32.vlgmr.msra.gmra.mrb[0].mxu1 %vm881_vm11, %v862_v10  ;;  %v681_v31 = vrot.slane %v215_v7, 2  ;;  %v812_v10 = vsel %vm801_vm7, %v1972_v34, %v2066_v6 }
  0xfd   : > { %489 = vrot.lane.b32.xlu0 %v1637_v16, %s1506_s24  ;;  %1289 = vmatmul.mubr.msk.f32.vlgmr.msra.gmra.mrb[0].mxu0 %vm881_vm11, %v854_v4  ;;  %v738_v16 = vsel %vm733_vm3, %v1733_v53, %v291_v19  ;;  %v804_v4 = vsel %vm801_vm7, %v1975_v55, %v2068_v38 }
  0xfe   : > { %v309_v9 = vpop.permute.xlu1 %308  ;;  %v293_v37 = vpop.permute.xlu0 %292  ;;  %v682_v17 = vsel %vm330_vm1, %v680_v35, %v681_v31 }
  0xff   : > { %v747_v30 = vsel %vm733_vm3, %v1743_v54, %v309_v9  ;;  %v739_v58 = vsel %vm733_vm3, %v2384_v57, %v293_v37 }
 0x100   : > { %556 = vrot.lane.b32.xlu1 %v525_v47, %s1507_s27  ;;  %v2387_v47 = vld [vmem:[#allocation7_spill] sm:$0xff] }
 0x101   : > { %540 = vrot.lane.b32.xlu0 %v1649_v20, %s1507_s27 }
 0x102   : > { %v396_v40 = vpop.permute.xlu1 %395  ;;  %v380_v50 = vpop.permute.xlu0 %379 }
 0x103   : > { %v763_v41 = vsel %vm750_vm4, %v746_v13, %v396_v40  ;;  %v755_v59 = vsel %vm750_vm4, %v738_v16, %v380_v50 }
 0x104   : > { %711 = vrot.lane.b32.xlu1 %v527_v39, %s1510_s6 }
 0x105   : > { %695 = vrot.lane.b32.xlu0 %v1656_v24, %s1510_s6 }
 0x106   : > { %v2107_v20 = vpop.permute.xlu1 %550  ;;  %v2109_v60 = vpop.permute.xlu0 %534 }
 0x108   : > { %558 = vrot.lane.b32.xlu1 %v527_v39, %s1507_s27 }
 0x109   : > { %542 = vrot.lane.b32.xlu0 %v1656_v24, %s1507_s27  ;;  %v216_v24 = vld [vmem:[%s1610_s10 + $0xe8] sm:$0x3]  ;;  %s175_s10 = sand.u32 1, %s1477_s13  }
 0x10a   : > { %v599_v53 = vpop.permute.xlu1 %598  ;;  %v583_v5 = vpop.permute.xlu0 %582  ;;  %v630_v15 = vrot.slane %v216_v24, 1  ;;  %v683_v46 = vrot.slane %v216_v24, 2  ;;  %s1227_s24 = sshll.u32 %s175_s10, 7  ;;  %s2307_s7 = scalar_lea.sflag [#allocation3], %s175_s10 }
 0x10b   : > { %v829_v8 = vsel %vm818_vm8, %v812_v10, %v599_v53  ;;  %v821_v9 = vsel %vm818_vm8, %v804_v4, %v583_v5  ;;  %v813_v5 = vsel %vm801_vm7, %v2043_v11, %v2107_v20  ;;  %v2389_v20 = vld [vmem:[#allocation10_spill] sm:$0xff]  ;;  %s2265_s27 = scalar_lea.vmem [#allocation2], %s1227_s24  ;;  %s1413_s24 = scalar_lea.vmem %s1412_s21, 4096 }
 0x10c   : > { %606 = vrot.lane.b32.xlu1 %v214_v52, %s1508_s28  ;;  %v631_v32 = vsel %vm241_vm0, %v628_v14, %v630_v15  ;;  %v684_v0 = vsel %vm330_vm1, %v681_v31, %v683_v46 }
 0x10d   : > { %590 = vrot.lane.b32.xlu0 %v1663_v26, %s1508_s28  ;;  %v629_v26 = vsel %vm241_vm0, %v627_v25, %v628_v14 }
 0x10e   : > { %v398_v61 = vpop.permute.xlu1 %397  ;;  %v382_v62 = vpop.permute.xlu0 %381 }
 0x10f   : > { %v764_v19 = vsel %vm750_vm4, %v747_v30, %v398_v61  ;;  %v756_v21 = vsel %vm750_vm4, %v739_v58, %v382_v62 }
 0x110   : > { %608 = vrot.lane.b32.xlu1 %v215_v7, %s1508_s28  ;;  %v805_v7 = vsel %vm801_vm7, %v2046_v12, %v2109_v60 }
 0x111   : > { %592 = vrot.lane.b32.xlu0 %v1669_v28, %s1508_s28  ;;  %s1256_s28 = sshll.u32 %s1485_s15, 4 }
 0x112   : > { %v446_v27 = vpop.permute.xlu1 %445  ;;  %v430_v54 = vpop.permute.xlu0 %429 }
 0x113   : > { %v780_v18 = vsel %vm767_vm5, %v763_v41, %v446_v27  ;;  %v772_v33 = vsel %vm767_vm5, %v755_v59, %v430_v54 }
 0x114   : > { %660 = vrot.lane.b32.xlu1 %v629_v26, %s1509_s29 }
 0x115   : > { %644 = vrot.lane.b32.xlu0 %v2385_v29, %s1509_s29 }
 0x116   : > { %v601_v45 = vpop.permute.xlu1 %600  ;;  %v585_v28 = vpop.permute.xlu0 %584 }
 0x117   : > { %v830_v25 = vsel %vm818_vm8, %v813_v5, %v601_v45  ;;  %v822_v14 = vsel %vm818_vm8, %v805_v7, %v585_v28 }
 0x118   : > { %662 = vrot.lane.b32.xlu1 %v631_v32, %s1509_s29 }
 0x119   : > { %646 = vrot.lane.b32.xlu0 %v2386_v48, %s1509_s29  ;;  %s1252_s29 = sshll.u32 %s1489_s16, 5  ;;  %s1144_s16 = sshll.u32 %s2265_s27, 4  ;;  %s2300_s16 = int_to_ptr.vmem [resolvable:$true] %s1144_s16 }
 0x11a   : > { %v653_v43 = vpop.permute.xlu1 %652  ;;  %v637_v44 = vpop.permute.xlu0 %636  ;;  %s1141_s9 = sadd.s32 %s1256_s28, %s1252_s29  ;;  %s1407_s8 = scalar_lea.vmem %s2300_s16, 2048 }
 0x11b   : > { %v846_v37 = vsel %vm835_vm9, %v829_v8, %v653_v43  ;;  %v838_v39 = vsel %vm835_vm9, %v821_v9, %v637_v44  ;;  %s1253_s15 = sshll.u32 %s1141_s9, 7  ;;  %p1408_p13 = scmp.ne.s32.totalorder %s2300_s16, %s1407_s8 }
 0x11c   : > { %713 = vrot.lane.b32.xlu1 %v682_v17, %s1510_s6  ;;  %p1414_p2 = scmp.lt.s32.totalorder %s2300_s16, %s1412_s21  ;;  %p1415_p4 = scmp.lt.s32.totalorder %s1413_s24, %s1407_s8 }
 0x11d   : > { %697 = vrot.lane.b32.xlu0 %v2387_v47, %s1510_s6  ;;  %p1409_p0 = pnand %p1408_p13, %p1584_p3 }
 0x11e   : > { %v448_v36 = vpop.permute.xlu1 %447  ;;  %v432_v51 = vpop.permute.xlu0 %431  ;;  %p1416_p5 = por %p1415_p4, %p1414_p2 }
 0x11f   : > { %v781_v56 = vsel %vm767_vm5, %v764_v19, %v448_v36  ;;  %v773_v42 = vsel %vm767_vm5, %v756_v21, %v432_v51  ;;  %v2390_v19 = vld [vmem:[#allocation11_spill] sm:$0xff]  ;;  %p1410_p1 = pneg %p1409_p0 }
 0x120   : > { %715 = vrot.lane.b32.xlu1 %v684_v0, %s1510_s6 }
 0x121   : > { %699 = vrot.lane.b32.xlu0 %v2388_v49, %s1510_s6  ;;  %s2297_s6 = scalar_lea.hbm %s2363_s3, %s1253_s15  ;;  %p1417_p6 = pnand %p1416_p5, %p1410_p1 }
 0x122   : > { %v500_v63 = vpop.permute.xlu1 %499  ;;  %v484_v1 = vpop.permute.xlu0 %483 }
 0x123   : > { %v2150_v22 = vsel %vm784_vm6, %v780_v18, %v500_v63  ;;  %v2153_v23 = vsel %vm784_vm6, %v772_v33, %v484_v1 }
 0x126   : > { %v655_v2 = vpop.permute.xlu1 %654  ;;  %v639_v3 = vpop.permute.xlu0 %638 }
 0x127   : > { %v847_v30 = vsel %vm835_vm9, %v830_v25, %v655_v2  ;;  %v839_v57 = vsel %vm835_vm9, %v822_v14, %v639_v3 }
 0x12a   : > { %v706_v13 = vpop.permute.xlu1 %705  ;;  %v690_v16 = vpop.permute.xlu0 %689 }
 0x12b   : > { %v863_v40 = vsel %vm852_vm10, %v846_v37, %v706_v13  ;;  %v855_v50 = vsel %vm852_vm10, %v838_v39, %v690_v16 }
 0x12c   : > { %1291 = vmatprep.mubr.msk.f32.mxu0 %vm881_vm11, %v855_v50  ;;  %1303 = vmatprep.mubr.msk.f32.mxu1 %vm881_vm11, %v863_v40 }
 0x12e   : > { %v311_v34 = vpop.permute.xlu1 %310  ;;  %v295_v55 = vpop.permute.xlu0 %294 }
 0x12f   : > { %v748_v60 = vsel %vm733_vm3, %v2389_v20, %v311_v34  ;;  %v740_v21 = vsel %vm733_vm3, %v2390_v19, %v295_v55 }
 0x132   : > { %v502_v6 = vpop.permute.xlu1 %501  ;;  %v486_v38 = vpop.permute.xlu0 %485 }
 0x133   : > { %v798_v41 = vsel %vm784_vm6, %v781_v56, %v502_v6  ;;  %v790_v59 = vsel %vm784_vm6, %v773_v42, %v486_v38 }
 0x136   : > { %v553_v52 = vpop.permute.xlu1 %552  ;;  %v537_v53 = vpop.permute.xlu0 %536 }
 0x137   : > { %v814_v42 = vsel %vm801_vm7, %v2150_v22, %v553_v52  ;;  %v806_v49 = vsel %vm801_vm7, %v2153_v23, %v537_v53 }
 0x13a   : > { %v708_v58 = vpop.permute.xlu1 %707  ;;  %v692_v61 = vpop.permute.xlu0 %691 }
 0x13b   : > { %v864_v62 = vsel %vm852_vm10, %v847_v30, %v708_v58  ;;  %v856_v24 = vsel %vm852_vm10, %v839_v57, %v692_v61 }
 0x13c   : > { %1292 = vmatmul.mubr.msk.f32.gmra.mrb[2].mxu0 %vm881_vm11, %v856_v24  ;;  %1304 = vmatmul.mubr.msk.f32.gmra.mrb[2].mxu1 %vm881_vm11, %v864_v62 }
 0x13e   : > { %v2185_v11 = vpop.permute.xlu1 %312  ;;  %v2187_v12 = vpop.permute.xlu0 %296 }
 0x142   : > { %v400_v26 = vpop.permute.xlu1 %399  ;;  %v384_v15 = vpop.permute.xlu0 %383 }
 0x143   : > { %v765_v27 = vsel %vm750_vm4, %v748_v60, %v400_v26  ;;  %v757_v54 = vsel %vm750_vm4, %v740_v21, %v384_v15  ;;  %v2391_v60 = vld [vmem:[#allocation12_spill] sm:$0xff]  ;;  %v2392_v15 = vld [vmem:[#allocation13_spill] sm:$0xff] }
 0x144   : > { %v749_v19 = vsel %vm733_vm3, %v2391_v60, %v2185_v11 }
 0x146   : > { %v555_v18 = vpop.permute.xlu1 %554  ;;  %v539_v33 = vpop.permute.xlu0 %538 }
 0x147   : > { %v815_v13 = vsel %vm801_vm7, %v798_v41, %v555_v18  ;;  %v807_v16 = vsel %vm801_vm7, %v790_v59, %v539_v33  ;;  %v741_v18 = vsel %vm733_vm3, %v2392_v15, %v2187_v12 }
 0x14a   : > { %v603_v35 = vpop.permute.xlu1 %602  ;;  %v587_v31 = vpop.permute.xlu0 %586 }
 0x14b   : > { %v831_v63 = vsel %vm818_vm8, %v814_v42, %v603_v35  ;;  %v823_v1 = vsel %vm818_vm8, %v806_v49, %v587_v31 }
 0x14e   : > { %v402_v29 = vpop.permute.xlu1 %401  ;;  %v386_v32 = vpop.permute.xlu0 %385 }
 0x14f   : > { %v758_v35 = vsel %vm750_vm4, %v741_v18, %v386_v32 }
 0x152   : > { %v450_v45 = vpop.permute.xlu1 %449  ;;  %v434_v28 = vpop.permute.xlu0 %433 }
 0x153   : > { %v782_v58 = vsel %vm767_vm5, %v765_v27, %v450_v45  ;;  %v774_v62 = vsel %vm767_vm5, %v757_v54, %v434_v28  ;;  %v766_v27 = vsel %vm750_vm4, %v749_v19, %v402_v29 }
 0x156   : > { %v605_v48 = vpop.permute.xlu1 %604  ;;  %v589_v17 = vpop.permute.xlu0 %588 }
 0x157   : > { %v832_v40 = vsel %vm818_vm8, %v815_v13, %v605_v48  ;;  %v824_v50 = vsel %vm818_vm8, %v807_v16, %v589_v17 }
 0x15a   : > { %v657_v46 = vpop.permute.xlu1 %656  ;;  %v641_v43 = vpop.permute.xlu0 %640 }
 0x15b   : > { %v848_v2 = vsel %vm835_vm9, %v831_v63, %v657_v46  ;;  %v840_v10 = vsel %vm835_vm9, %v823_v1, %v641_v43 }
 0x15e   : > { %v452_v44 = vpop.permute.xlu1 %451 }
 0x15f   : > { %v436_v47 = vpop.permute.xlu0 %435  ;;  %v783_v31 = vsel %vm767_vm5, %v766_v27, %v452_v44 }
 0x160   : > { %v775_v48 = vsel %vm767_vm5, %v758_v35, %v436_v47 }
 0x162   : > { %v504_v0 = vpop.permute.xlu1 %503 }
 0x163   : > { %v488_v36 = vpop.permute.xlu0 %487  ;;  %v799_v24 = vsel %vm784_vm6, %v782_v58, %v504_v0 }
 0x164   : > { %v791_v21 = vsel %vm784_vm6, %v774_v62, %v488_v36 }
 0x166   : > { %v659_v51 = vpop.permute.xlu1 %658 }
 0x167   : > { %v643_v56 = vpop.permute.xlu0 %642  ;;  %v849_v34 = vsel %vm835_vm9, %v832_v40, %v659_v51 }
 0x168   : > { %v841_v6 = vsel %vm835_vm9, %v824_v50, %v643_v56 }
 0x16a   : > { %v710_v3 = vpop.permute.xlu1 %709 }
 0x16b   : > { %v865_v4 = vsel %vm852_vm10, %v848_v2, %v710_v3  ;;  %v694_v8 = vpop.permute.xlu0 %693  ;;  %v2257_v2 = vld [vmem:[%s2362_s2] ss:$0 sm:$0xff] }
 0x16c   : > { %v857_v9 = vsel %vm852_vm10, %v840_v10, %v694_v8  ;;  %1306 = vmatprep.mubr.msk.f32.mxu1 %vm881_vm11, %v865_v4 }
 0x16d   : > { %1294 = vmatprep.mubr.msk.f32.mxu0 %vm881_vm11, %v857_v9 }
 0x16e   : > { %v506_v22 = vpop.permute.xlu1 %505 }
 0x16f   : > { %v490_v23 = vpop.permute.xlu0 %489  ;;  %v800_v17 = vsel %vm784_vm6, %v783_v31, %v506_v22 }
 0x170   : > { %v792_v43 = vsel %vm784_vm6, %v775_v48, %v490_v23 }
 0x172   : > { %v557_v37 = vpop.permute.xlu1 %556 }
 0x173   : > { %v541_v39 = vpop.permute.xlu0 %540  ;;  %v816_v26 = vsel %vm801_vm7, %v799_v24, %v557_v37 }
 0x174   : > { %v808_v33 = vsel %vm801_vm7, %v791_v21, %v541_v39 }
 0x176   : > { %v712_v55 = vpop.permute.xlu1 %711 }
 0x177   : > { %v866_v38 = vsel %vm852_vm10, %v849_v34, %v712_v55  ;;  %v696_v52 = vpop.permute.xlu0 %695 }
 0x178   : > { %v858_v53 = vsel %vm852_vm10, %v841_v6, %v696_v52  ;;  %1307 = vmatmul.mubr.msk.f32.gmra.mrb[4].mxu1 %vm881_vm11, %v866_v38 }
 0x179   : > { %1295 = vmatmul.mubr.msk.f32.gmra.mrb[4].mxu0 %vm881_vm11, %v858_v53 }
 0x17a   : > { %v559_v41 = vpop.permute.xlu1 %558 }
 0x17b   : > { %v543_v59 = vpop.permute.xlu0 %542  ;;  %v817_v32 = vsel %vm801_vm7, %v800_v17, %v559_v41 }
 0x17c   : > { %v809_v0 = vsel %vm801_vm7, %v792_v43, %v543_v59 }
 0x17e   : > { %v607_v5 = vpop.permute.xlu1 %606 }
 0x17f   : > { %v591_v7 = vpop.permute.xlu0 %590  ;;  %v833_v54 = vsel %vm818_vm8, %v816_v26, %v607_v5 }
 0x180   : > { %v825_v11 = vsel %vm818_vm8, %v808_v33, %v591_v7 }
 0x182   : > { %v609_v25 = vpop.permute.xlu1 %608 }
 0x183   : > { %v593_v14 = vpop.permute.xlu0 %592  ;;  %v834_v47 = vsel %vm818_vm8, %v817_v32, %v609_v25 }
 0x184   : > { %v826_v36 = vsel %vm818_vm8, %v809_v0, %v593_v14 }
 0x186   : > { %v661_v30 = vpop.permute.xlu1 %660 }
 0x187   : > { %v645_v57 = vpop.permute.xlu0 %644  ;;  %v850_v45 = vsel %vm835_vm9, %v833_v54, %v661_v30 }
 0x188   : > { %v842_v12 = vsel %vm835_vm9, %v825_v11, %v645_v57 }
 0x18a   : > { %v663_v61 = vpop.permute.xlu1 %662 }
 0x18b   : > { %v647_v20 = vpop.permute.xlu0 %646  ;;  %v851_v51 = vsel %vm835_vm9, %v834_v47, %v663_v61 }
 0x18c   : > { %v843_v42 = vsel %vm835_vm9, %v826_v36, %v647_v20 }
 0x18e   : > { %v714_v28 = vpop.permute.xlu1 %713 }
 0x18f   : > { %v867_v29 = vsel %vm852_vm10, %v850_v45, %v714_v28  ;;  %v698_v46 = vpop.permute.xlu0 %697 }
 0x190   : > { %v859_v44 = vsel %vm852_vm10, %v842_v12, %v698_v46  ;;  %1309 = vmatprep.mubr.msk.f32.mxu1 %vm881_vm11, %v867_v29 }
 0x191   : > { %1297 = vmatprep.mubr.msk.f32.mxu0 %vm881_vm11, %v859_v44 }
 0x192   : > { %v716_v56 = vpop.permute.xlu1 %715 }
 0x193   : > { %v868_v49 = vsel %vm852_vm10, %v851_v51, %v716_v56  ;;  %v700_v63 = vpop.permute.xlu0 %699 }
 0x194   : > { %v860_v1 = vsel %vm852_vm10, %v843_v42, %v700_v63  ;;  %1310 = vmatmul.mubr.msk.f32.gmra.mrb[6].mxu1 %vm881_vm11, %v868_v49 }
 0x195   : > { %1298 = vmatmul.mubr.msk.f32.gmra.mrb[6].mxu0 %vm881_vm11, %v860_v1 }
 0x1cf   : > { %v1302_v3 = vpop.f32.mrb[0].mxu1 }
 0x1d0   : > { %v1290_v10 = vpop.f32.mrb[0].mxu0  ;;  %v1046_v4 = vadd.f32 %v1302_v3, %v2257_v2  ;;  %v1040_v8 = vpop.f32.mrb[1].mxu1 }
 0x1d1   : > { %v1006_v9 = vadd.f32 %v1290_v10, %v2257_v2  ;;  %v1000_v22 = vpop.f32.mrb[1].mxu0  ;;  %v1041_v23 = vadd.f32 %v2257_v2, %v1040_v8 }
 0x1d2   : > { %v1088_v37 = vmax.f32 %v1046_v4, 0.0  ;;  %v1001_v39 = vadd.f32 %v2257_v2, %v1000_v22 }
 0x1d3   : > { %v1080_v13 = vmax.f32 %v1006_v9, 0.0  ;;  %v1087_v16 = vmax.f32 %v1041_v23, 0.0 }
 0x1d4   : > { %v1104_v40 = vmin.f32 %v1088_v37, 6.0  ;;  %v1079_v50 = vmax.f32 %v1001_v39, 0.0 }
 0x1d5   : > { %v1096_v34 = vmin.f32 %v1080_v13, 6.0  ;;  %v1103_v55 = vmin.f32 %v1087_v16, 6.0 }
 0x1d6   : > { %1120 = vst [vmem:[%s2265_s27 + $0x48] sm:$0xff] %v1104_v40  ;;  %v1095_v6 = vmin.f32 %v1079_v50, 6.0 }
 0x1d7   : > { %1112 = vst [vmem:[%s2265_s27 + $0x8] sm:$0xff] %v1096_v34  ;;  %1119 = vst [vmem:[%s2265_s27 + $0x40] sm:$0xff] %v1103_v55 }
 0x1d8   : > { %1111 = vst [vmem:[%s2265_s27] sm:$0xff] %v1095_v6 }
 0x20f   : > { %v1293_v38 = vpop.f32.mrb[2].mxu0  ;;  %v1305_v52 = vpop.f32.mrb[2].mxu1 }
 0x210   : > { %v1016_v53 = vadd.f32 %v1293_v38, %v2257_v2  ;;  %v1056_v41 = vadd.f32 %v1305_v52, %v2257_v2  ;;  %v1010_v59 = vpop.f32.mrb[3].mxu0  ;;  %v1050_v5 = vpop.f32.mrb[3].mxu1 }
 0x211   : > { %v1011_v7 = vadd.f32 %v2257_v2, %v1010_v59  ;;  %v1051_v25 = vadd.f32 %v2257_v2, %v1050_v5 }
 0x212   : > { %v1082_v14 = vmax.f32 %v1016_v53, 0.0  ;;  %v1090_v30 = vmax.f32 %v1056_v41, 0.0 }
 0x213   : > { %v1081_v57 = vmax.f32 %v1011_v7, 0.0  ;;  %v1089_v58 = vmax.f32 %v1051_v25, 0.0 }
 0x214   : > { %v1098_v61 = vmin.f32 %v1082_v14, 6.0  ;;  %v1106_v62 = vmin.f32 %v1090_v30, 6.0 }
 0x215   : > { %v1097_v24 = vmin.f32 %v1081_v57, 6.0  ;;  %v1105_v20 = vmin.f32 %v1089_v58, 6.0 }
 0x216   : > { %1114 = vst [vmem:[%s2265_s27 + $0x18] sm:$0xff] %v1098_v61  ;;  %1122 = vst [vmem:[%s2265_s27 + $0x58] sm:$0xff] %v1106_v62 }
 0x217   : > { %1113 = vst [vmem:[%s2265_s27 + $0x10] sm:$0xff] %v1097_v24  ;;  %1121 = vst [vmem:[%s2265_s27 + $0x50] sm:$0xff] %v1105_v20 }
 0x24b   : > { %v1308_v60 = vpop.f32.mrb[4].mxu1 }
 0x24c   : > { %v1296_v19 = vpop.f32.mrb[4].mxu0  ;;  %v1066_v21 = vadd.f32 %v1308_v60, %v2257_v2  ;;  %v1060_v26 = vpop.f32.mrb[5].mxu1 }
 0x24d   : > { %v1026_v15 = vadd.f32 %v1296_v19, %v2257_v2  ;;  %v1020_v18 = vpop.f32.mrb[5].mxu0  ;;  %v1061_v27 = vadd.f32 %v2257_v2, %v1060_v26 }
 0x24e   : > { %v1092_v33 = vmax.f32 %v1066_v21, 0.0  ;;  %v1021_v54 = vadd.f32 %v2257_v2, %v1020_v18 }
 0x24f   : > { %v1084_v35 = vmax.f32 %v1026_v15, 0.0  ;;  %v1091_v31 = vmax.f32 %v1061_v27, 0.0 }
 0x250   : > { %v1108_v11 = vmin.f32 %v1092_v33, 6.0  ;;  %v1083_v45 = vmax.f32 %v1021_v54, 0.0 }
 0x251   : > { %v1100_v28 = vmin.f32 %v1084_v35, 6.0  ;;  %v1107_v48 = vmin.f32 %v1091_v31, 6.0 }
 0x252   : > { %1124 = vst [vmem:[%s2265_s27 + $0x68] sm:$0xff] %v1108_v11  ;;  %v1099_v17 = vmin.f32 %v1083_v45, 6.0 }
 0x253   : > { %1116 = vst [vmem:[%s2265_s27 + $0x28] sm:$0xff] %v1100_v28  ;;  %1123 = vst [vmem:[%s2265_s27 + $0x60] sm:$0xff] %v1107_v48 }
 0x254   : > { %1115 = vst [vmem:[%s2265_s27 + $0x20] sm:$0xff] %v1099_v17 }
 0x267   : > { %v1311_v12 = vpop.f32.mrb[6].mxu1 }
 0x268   : > { %v1299_v29 = vpop.f32.mrb[6].mxu0  ;;  %v1076_v46 = vadd.f32 %v1311_v12, %v2257_v2  ;;  %v1070_v43 = vpop.f32.mrb[7].mxu1 }
 0x269   : > { %v1036_v32 = vadd.f32 %v1299_v29, %v2257_v2  ;;  %v1030_v44 = vpop.f32.mrb[7].mxu0  ;;  %v1071_v0 = vadd.f32 %v2257_v2, %v1070_v43 }
 0x26a   : > { %v1094_v47 = vmax.f32 %v1076_v46, 0.0  ;;  %v1031_v36 = vadd.f32 %v2257_v2, %v1030_v44 }
 0x26b   : > { %v1086_v51 = vmax.f32 %v1036_v32, 0.0  ;;  %v1093_v56 = vmax.f32 %v1071_v0, 0.0 }
 0x26c   : > { %v1110_v42 = vmin.f32 %v1094_v47, 6.0  ;;  %v1085_v49 = vmax.f32 %v1031_v36, 0.0 }
 0x26d   : > { %v1102_v63 = vmin.f32 %v1086_v51, 6.0  ;;  %v1109_v1 = vmin.f32 %v1093_v56, 6.0 }
 0x26e   : > { %1126 = vst [vmem:[%s2265_s27 + $0x78] sm:$0xff] %v1110_v42  ;;  %v1101_v3 = vmin.f32 %v1085_v49, 6.0 }
 0x26f   : > { %1118 = vst [vmem:[%s2265_s27 + $0x38] sm:$0xff] %v1102_v63  ;;  %1125 = vst [vmem:[%s2265_s27 + $0x70] sm:$0xff] %v1109_v1 }
 0x270   : > { %1117 = vst [vmem:[%s2265_s27 + $0x30] sm:$0xff] %v1101_v3 }
 0x271   : > { %1420 = shalt.err (!%p1417_p6)
}
 0x272   : > { %s1421_s10 = scalar_lea.hbm %s2297_s6, 2048  ;;  %s1425_s29 = scalar_lea.hbm %s2363_s3, 8192 }
 0x273   : > { %p1422_p7 = scmp.ne.s32.totalorder %s2297_s6, %s1421_s10  ;;  %p1426_p11 = scmp.lt.u32.totalorder %s2297_s6, %s2363_s3 }
 0x274   : > { %p1427_p12 = scmp.lt.u32.totalorder %s1425_s29, %s1421_s10  ;;  %p1429_p0 = scmp.lt.u32.totalorder %s1421_s10, %s2297_s6 }
 0x275   : > { %p1423_p9 = pnand %p1422_p7, %p1584_p3 }
 0x276   : > { %p1428_p13 = por %p1427_p12, %p1426_p11 }
 0x277   : > { %p1424_p10 = pneg %p1423_p9 }
 0x278   : > { %p1430_p1 = por %p1429_p0, %p1428_p13 }
 0x27a   : > { %p1431_p2 = pnand %p1430_p1, %p1424_p10 }
 0x27c   : > { %1434 = shalt.err (!%p1431_p2)
}
 0x27d   : > { %s1512_s4 = smov 128  }
 0x27e   : > { %1327 = dma.vmem_to_hbm [thread:$0]  (%p1584_p3), %s2300_s16, 2048, %s2297_s6, %s2307_s7, %s1512_s4, %s1512_s4, %s1504_s20  }
 0x27f PF: > { %p1333_p4 = scmp.ge.s32.totalorder %s1501_s19, 2  ;;  %s1159_s5 = sand.u32 1, %s1473_s12  }
 0x280   : > { %s1160_s8 = scalar_lea.sflag [#allocation3], %s1159_s5 }
 0x281   : > { %p1330_p5 = pnand %p1333_p4, %p1593_p8 }
 0x283   : > { %1468 = dma.done.wait (!%p1330_p5), %s1160_s8, 2048  }
 0x284   : > { %1470 = vsyncadd (!%p1330_p5), %s1160_s8, 4294965248  ;;  %s16_s19 = sadd.s32 1, %s1501_s19   ;;  %s2393_s12 = smov %s1477_s13 }
 0x285   : > { %p13_p6 = scmp.ge.s32.totalorder %s16_s19, 6   ;;  %s2394_s13 = smov %s1481_s14 }
 0x286   : > { %s2395_s14 = smov %s1602_s30  ;;  %s2396_s15 = smov %s1493_s17 }
 0x287   : > { %s2397_s16 = smov %s1497_s18  ;;  %s2398_s17 = smov %s2401_s22 }
 0x288   : > { %s2399_s18 = smov %s2405_s23  ;;  %15 = sbr.rel (!%p13_p6) target bundleno = 5 (0x5), region = 68 }
 0x28f   :  { %1165 = vsyncpa [#allocation3], 1 }
 0x290   :  { %1167 = vsyncpa [#allocation3 + $0x1], 1 }

</bundles_post_ra>
